<compile_context>
chip_gen: v5e
topology: v5e:2x2
jax: 0.10.0
libtpu: 0.0.40
codegen_flags: <defaults>
</compile_context>

<pallas_src>
import functools
import math

import jax
import jax.numpy as jnp
from jax.experimental import pallas as pl
from jax.experimental.pallas import tpu as pltpu


def _round_up(v, m):
    return (v + m - 1) // m * m


def _pad2d(a, rows, cols):
    pr = rows - a.shape[0]
    pc = cols - a.shape[1]
    if pr or pc:
        a = jnp.pad(a, ((0, pr), (0, pc)))
    return a


def _plan(n, f, tm, tk):
    """Tile plan shared by prepare_adj() and graph_convolution()."""
    tm = _round_up(min(tm, _round_up(n, 16)), 16)
    # v7x has 2 TensorCores; give the "parallel" row axis >= 2 tiles whenever possible.
    if _round_up(n, tm) // tm < 2 and n > 16:
        tm = _round_up((n + 1) // 2, 16)
    tk = _round_up(min(tk, _round_up(n, 128)), 128)
    fp = _round_up(f, 128)
    n_pm = _round_up(n, tm)
    n_pk = _round_up(n, tk)
    return tm, tk, fp, n_pm, n_pk


def prepare_adj(adj, *, tm=512, tk=1024, matmul_dtype=jnp.bfloat16):
    """Pad + cast the adjacency once; reuse it across all GCNII layers."""
    n = adj.shape[0]
    tm, tk, _, n_pm, n_pk = _plan(n, 1, tm, tk)
    return _pad2d(adj, n_pm, n_pk).astype(matmul_dtype)


def _gcn_kernel(adj_ref, x_ref, h0_ref, w_ref, *rest,
                alpha, residual, x_resident, tk, epi_rows):
    # adj_ref:  (tm, tk)         adjacency tile, f32 or bf16 (grid index (i, k))
    # x_ref:    (N_pk, Fp) bf16  resident features, or (tk, Fp) streamed tile
    # h0_ref:   (tm, Fp)   bf16  initial-feature row tile (resident across k)
    # w_ref:    (Fp, Fp)   bf16  folded weight W_eff = theta*W + (1-theta)*I (constant)
    # xres_ref: (tm, Fp)   bf16  residual row tile (only if residual)
    # o_ref:    (tm, Fp)         output row tile
    # acc_ref:  (tm, Fp)   f32   VMEM accumulator for support
    if residual:
        xres_ref, o_ref, acc_ref = rest
    else:
        o_ref, acc_ref = rest

    k = pl.program_id(1)

    @pl.when(k == 0)
    def _init():
        # (1-alpha) is folded into the x cast on the host, so the accumulator just
        # starts at alpha*h0 and the epilogue blend disappears.
        acc_ref[...] = alpha * h0_ref[...].astype(jnp.float32)

    if x_resident:
        start = pl.multiple_of(k * tk, tk)
        x_tile = x_ref[pl.ds(start, tk), :]
    else:
        x_tile = x_ref[...]

    # adj may arrive as f32 (single-shot path): cast the tile to bf16 for the MXU.
    adj_tile = adj_ref[...].astype(x_tile.dtype)
    acc_ref[...] += jnp.dot(adj_tile, x_tile, preferred_element_type=jnp.float32)

    @pl.when(k == pl.num_programs(1) - 1)
    def _finalize():
        tm = acc_ref.shape[0]
        # theta*(support@W) + (1-theta)*support pre-folded into W_eff.
        # Chunk the epilogue so support/out live ranges stay bounded at large tm.
        for r0 in range(0, tm, epi_rows):
            rows = min(epi_rows, tm - r0)
            support = acc_ref[pl.ds(r0, rows), :].astype(w_ref.dtype)
            out = jnp.dot(support, w_ref[...], preferred_element_type=jnp.float32)
            if residual:
                out = out + xres_ref[pl.ds(r0, rows), :].astype(jnp.float32)
            o_ref[pl.ds(r0, rows), :] = out.astype(o_ref.dtype)


def graph_convolution(x, adj, h0, weight, *, lamda, alpha, l,
                      residual=False, tm=512, tk=1024,
                      matmul_dtype=jnp.bfloat16,
                      x_resident_max_bytes=8 * 1024 * 1024,
                      epi_rows=256,
                      vmem_limit_bytes=None):
    """Pallas implementation of GraphConvolution.forward (variant=False).

    `adj` may be the raw (N, N) float32 adjacency, or the output of `prepare_adj`
    (padded + bf16-cast once, amortized across GCNII layers).
    """
    N, F = x.shape
    Fi, Fo = weight.shape
    assert h0.shape == (N, F)
    assert Fi == F
    assert F == Fo, "non-variant GraphConvolution broadcast requires F == Fo"

    out_dtype = x.dtype
    theta = math.log(lamda / l + 1.0)

    tm, tk, Fp, N_pm, N_pk = _plan(N, F, tm, tk)

    # Adjacency: avoid the host pad+cast pre-pass whenever possible.
    if adj.shape == (N_pm, N_pk):
        adj_p = adj                       # pre-prepared or already aligned (incl. raw f32)
    else:
        assert adj.shape == (N, N), f"adj shape {adj.shape} incompatible with tile plan"
        # Padding forces a full copy anyway -> fold the bf16 cast into the same pass.
        adj_p = _pad2d(adj, N_pm, N_pk).astype(matmul_dtype)
    # TODO(synk): optional int8 (v5e/v6e) / fp8 (v7x) adj quantization for HBM-bound graphs.

    # x feeds the MXU in bf16 with (1-alpha) folded into the cast; h0/residual stay bf16.
    x_mm = (_pad2d(x, N_pk, Fp) * (1.0 - alpha)).astype(matmul_dtype)
    h0_p = _pad2d(h0, N_pm, Fp).astype(matmul_dtype)
    # theta-blend folded into the weight; epilogue matmul runs in bf16 (f32 accumulate).
    w_eff = (theta * _pad2d(weight, Fp, Fp)
             + (1.0 - theta) * jnp.eye(Fp, dtype=jnp.float32)).astype(matmul_dtype)

    bpe = jnp.dtype(matmul_dtype).itemsize
    x_resident = N_pk * Fp * bpe <= x_resident_max_bytes
    if x_resident:
        x_spec = pl.BlockSpec((N_pk, Fp), lambda i, k: (0, 0))   # one DMA, sliced in-kernel
    else:
        x_spec = pl.BlockSpec((tk, Fp), lambda i, k: (k, 0))     # streamed per k tile

    operands = [adj_p, x_mm, h0_p, w_eff]
    in_specs = [
        pl.BlockSpec((tm, tk), lambda i, k: (i, k)),   # adj tile (the one true stream)
        x_spec,
        pl.BlockSpec((tm, Fp), lambda i, k: (i, 0)),   # h0 row tile (resident across k)
        pl.BlockSpec((Fp, Fp), lambda i, k: (0, 0)),   # folded weight (constant)
    ]
    if residual:
        operands.append(_pad2d(x, N_pm, Fp).astype(matmul_dtype))
        in_specs.append(pl.BlockSpec((tm, Fp), lambda i, k: (i, 0)))

    grid = (N_pm // tm, N_pk // tk)

    # VMEM budget: 2 buffers per pipelined operand + output + f32 accumulator + headroom,
    # clamped to v7x's 64 MiB physical VMEM.
    obpe = jnp.dtype(out_dtype).itemsize
    vmem_bytes = 2 * tm * tk * jnp.dtype(adj_p.dtype).itemsize
    vmem_bytes += 2 * (N_pk if x_resident else tk) * Fp * bpe
    vmem_bytes += 2 * tm * Fp * bpe              # h0
    vmem_bytes += 2 * Fp * Fp * bpe              # w_eff
    if residual:
        vmem_bytes += 2 * tm * Fp * bpe
    vmem_bytes += 2 * tm * Fp * obpe             # output
    vmem_bytes += tm * Fp * 4                    # accumulator scratch
    if vmem_limit_bytes is None:
        vmem_limit_bytes = min(max(int(vmem_bytes * 1.25) + (4 << 20), 16 << 20),
                               64 << 20)

    x_reads = 1 if x_resident else (N_pm // tm)
    bytes_accessed = (N_pm * N_pk * jnp.dtype(adj_p.dtype).itemsize
                      + x_reads * N_pk * Fp * bpe
                      + N_pm * Fp * bpe
                      + Fp * Fp * bpe
                      + (N_pm * Fp * bpe if residual else 0)
                      + N_pm * Fp * obpe)
    flops = 2 * N_pm * N_pk * Fp + 2 * N_pm * Fp * Fp

    kernel = functools.partial(
        _gcn_kernel, alpha=float(alpha), residual=residual,
        x_resident=x_resident, tk=tk, epi_rows=min(epi_rows, tm))

    out_p = pl.pallas_call(
        kernel,
        out_shape=jax.ShapeDtypeStruct((N_pm, Fp), out_dtype),
        grid_spec=pltpu.PrefetchScalarGridSpec(
            num_scalar_prefetch=0,
            grid=grid,
            in_specs=in_specs,
            out_specs=pl.BlockSpec((tm, Fp), lambda i, k: (i, 0)),
            scratch_shapes=[pltpu.VMEM((tm, Fp), jnp.float32)],
        ),
        compiler_params=pltpu.CompilerParams(
            dimension_semantics=("parallel", "arbitrary"),
            vmem_limit_bytes=int(vmem_limit_bytes),
        ),
        cost_estimate=pl.CostEstimate(
            flops=int(flops), transcendentals=0,
            bytes_accessed=int(bytes_accessed)),
    )(*operands)

    return out_p[:N, :F]


def graph_convolution_ref(x, adj, h0, weight, *, lamda, alpha, l, residual=False):
    theta = math.log(lamda / l + 1.0)
    hi = adj @ x
    support = (1.0 - alpha) * hi + alpha * h0
    out = theta * (support @ weight) + (1.0 - theta) * support
    if residual:
        out = out + x
    return out


def _make_inputs(key, n, f):
    k_x, k_adj, k_h0, k_w = jax.random.split(key, 4)
    x = jax.random.normal(k_x, (n, f), dtype=jnp.float32)
    h0 = jax.random.normal(k_h0, (n, f), dtype=jnp.float32)
    a = jax.random.uniform(k_adj, (n, n), dtype=jnp.float32)
    adj = (a + a.T) * 0.5
    adj = adj / jnp.sum(adj, axis=1, keepdims=True)
    stdv = 1.0 / math.sqrt(f)
    weight = jax.random.uniform(k_w, (f, f), dtype=jnp.float32,
                                minval=-stdv, maxval=stdv)
    return x, adj, h0, weight


if __name__ == "__main__":
    key = jax.random.PRNGKey(0)
    lamda, alpha = 0.5, 0.1

    # Case A: aligned shapes, multi-step K accumulation (tk=128 -> 4 k-steps).
    N, F = 512, 128
    x, adj, h0, weight = _make_inputs(key, N, F)

    # A1: raw f32 adj handed straight to the kernel (in-kernel bf16 cast), resident x.
    out = graph_convolution(x, adj, h0, weight, lamda=lamda, alpha=alpha, l=1,
                            residual=False, tm=512, tk=128)
    out = jax.block_until_ready(out)
    ref = graph_convolution_ref(x, adj, h0, weight, lamda=lamda, alpha=alpha, l=1,
                                residual=False)
    assert out.shape == (N, F)
    assert jnp.allclose(out, ref, atol=2e-2, rtol=2e-2), (
        f"mismatch (raw adj): max |err| = {float(jnp.max(jnp.abs(out - ref)))}")

    # A2: adjacency pre-cast ONCE (amortized across layers), residual path,
    #     x forced onto the streamed-tile path.
    adj_prep = prepare_adj(adj, tm=512, tk=128)
    out = graph_convolution(x, adj_prep, h0, weight, lamda=lamda, alpha=alpha, l=1,
                            residual=True, tm=512, tk=128, x_resident_max_bytes=0)
    out = jax.block_until_ready(out)
    ref = graph_convolution_ref(x, adj, h0, weight, lamda=lamda, alpha=alpha, l=1,
                                residual=True)
    assert out.shape == (N, F)
    assert jnp.allclose(out, ref, atol=2e-2, rtol=2e-2), (
        f"mismatch (prepared adj, residual): "
        f"max |err| = {float(jnp.max(jnp.abs(out - ref)))}")

    # Case B: unaligned shapes -> node/feature padding and tile clamping.
    N2, F2 = 200, 96
    x2, adj2, h02, w2 = _make_inputs(jax.random.PRNGKey(1), N2, F2)
    out2 = graph_convolution(x2, adj2, h02, w2, lamda=lamda, alpha=alpha, l=2,
                             residual=False)
    out2 = jax.block_until_ready(out2)
    ref2 = graph_convolution_ref(x2, adj2, h02, w2, lamda=lamda, alpha=alpha, l=2,
                                 residual=False)
    assert out2.shape == (N2, F2)
    assert jnp.allclose(out2, ref2, atol=2e-2, rtol=2e-2), (
        f"mismatch (padded case): max |err| = {float(jnp.max(jnp.abs(out2 - ref2)))}")

    # TODO(synk): variant=True path (concat [hi, h0] along features, 2F-wide weight)
    # is not wired into the kernel; only the default variant=False semantics are implemented.
    print("KERNEL_OK")
</pallas_src>

<mosaic_0001>
module attributes {stable_mosaic.version = 11 : i64} {
  func.func @_gcn_kernel(%arg0: i32, %arg1: i32, %arg2: memref<256x128xf32, #tpu.memory_space<vmem>>, %arg3: memref<512x128xbf16, #tpu.memory_space<vmem>>, %arg4: memref<256x128xbf16, #tpu.memory_space<vmem>>, %arg5: memref<128x128xbf16, #tpu.memory_space<vmem>>, %arg6: memref<256x128xf32, #tpu.memory_space<vmem>>, %arg7: memref<256x128xf32, #tpu.memory_space<vmem>>) attributes {dimension_semantics = [#tpu.dimension_semantics<parallel>, #tpu.dimension_semantics<arbitrary>], iteration_bounds = array<i64: 2, 4>, scalar_prefetch = 0 : i64, scratch_operands = 1 : i64, tpu.core_type = #tpu.core_type<tc>, window_params = [{transform_indices = @transform_0, window_bounds = array<i64: 256, 128>}, {pipeline_mode = #tpu.pipeline_mode<synchronous>, transform_indices = @transform_1, window_bounds = array<i64: 512, 128>}, {transform_indices = @transform_2, window_bounds = array<i64: 256, 128>}, {pipeline_mode = #tpu.pipeline_mode<synchronous>, transform_indices = @transform_3, window_bounds = array<i64: 128, 128>}, {transform_indices = @transform_4, window_bounds = array<i64: 256, 128>}]} {
    %c0_i32 = arith.constant 0 : i32
    %0 = arith.cmpi eq, %arg1, %c0_i32 : i32
    %1 = arith.extui %0 : i1 to i32
    %c0_i32_0 = arith.constant 0 : i32
    %2 = arith.cmpi ne, %1, %c0_i32_0 : i32
    scf.if %2 {
      %c0_8 = arith.constant 0 : index
      %c0_9 = arith.constant 0 : index
      %16 = vector.load %arg4[%c0_8, %c0_9] : memref<256x128xbf16, #tpu.memory_space<vmem>>, vector<256x128xbf16>
      %17 = arith.extf %16 : vector<256x128xbf16> to vector<256x128xf32>
      %cst_10 = arith.constant 1.000000e-01 : f32
      %18 = vector.broadcast %cst_10 : f32 to vector<256x128xf32>
      %19 = arith.mulf %18, %17 : vector<256x128xf32>
      %c0_11 = arith.constant 0 : index
      %c0_12 = arith.constant 0 : index
      %20 = vector.load %arg7[%c0_11, %c0_12] : memref<256x128xf32, #tpu.memory_space<vmem>>, vector<256x128xf32>
      tpu.vector_store %arg7[%c0_11, %c0_12], %19 {strides = array<i32>} : memref<256x128xf32, #tpu.memory_space<vmem>>, vector<256x128xf32>,
    } else {
    }
    %c128_i32 = arith.constant 128 : i32
    %3 = arith.muli %arg1, %c128_i32 : i32
    %4 = tpu.assume_multiple %3, 128 : i32
    %5 = arith.index_cast %4 : i32 to index
    %c0 = arith.constant 0 : index
    %6 = vector.load %arg3[%5, %c0] : memref<512x128xbf16, #tpu.memory_space<vmem>>, vector<128x128xbf16>
    %c0_1 = arith.constant 0 : index
    %c0_2 = arith.constant 0 : index
    %7 = vector.load %arg2[%c0_1, %c0_2] : memref<256x128xf32, #tpu.memory_space<vmem>>, vector<256x128xf32>
    %8 = arith.truncf %7 : vector<256x128xf32> to vector<256x128xbf16>
    %c0_3 = arith.constant 0 : index
    %c0_4 = arith.constant 0 : index
    %9 = vector.load %arg7[%c0_3, %c0_4] : memref<256x128xf32, #tpu.memory_space<vmem>>, vector<256x128xf32>
    %cst = arith.constant dense<0.000000e+00> : vector<256x128xf32>
    %10 = tpu.matmul %8, %6, %cst {dimension_numbers = #tpu.dot_dimension_numbers<[1], [0], [0], [1], [0, 0, 1, 1], [], []>} : vector<256x128xbf16>, vector<128x128xbf16>, vector<256x128xf32> -> vector<256x128xf32>
    %11 = arith.addf %9, %10 : vector<256x128xf32>
    %c0_5 = arith.constant 0 : index
    %c0_6 = arith.constant 0 : index
    %12 = vector.load %arg7[%c0_5, %c0_6] : memref<256x128xf32, #tpu.memory_space<vmem>>, vector<256x128xf32>
    tpu.vector_store %arg7[%c0_5, %c0_6], %11 {strides = array<i32>} : memref<256x128xf32, #tpu.memory_space<vmem>>, vector<256x128xf32>,
    %c3_i32 = arith.constant 3 : i32
    %13 = arith.cmpi eq, %arg1, %c3_i32 : i32
    %14 = arith.extui %13 : i1 to i32
    %c0_i32_7 = arith.constant 0 : i32
    %15 = arith.cmpi ne, %14, %c0_i32_7 : i32
    scf.if %15 {
      %c0_8 = arith.constant 0 : index
      %c0_9 = arith.constant 0 : index
      %16 = vector.load %arg7[%c0_8, %c0_9] : memref<256x128xf32, #tpu.memory_space<vmem>>, vector<256x128xf32>
      %17 = arith.truncf %16 : vector<256x128xf32> to vector<256x128xbf16>
      %c0_10 = arith.constant 0 : index
      %c0_11 = arith.constant 0 : index
      %18 = vector.load %arg5[%c0_10, %c0_11] : memref<128x128xbf16, #tpu.memory_space<vmem>>, vector<128x128xbf16>
      %cst_12 = arith.constant dense<0.000000e+00> : vector<256x128xf32>
      %19 = tpu.matmul %17, %18, %cst_12 {dimension_numbers = #tpu.dot_dimension_numbers<[1], [0], [0], [1], [0, 0, 1, 1], [], []>} : vector<256x128xbf16>, vector<128x128xbf16>, vector<256x128xf32> -> vector<256x128xf32>
      %c0_13 = arith.constant 0 : index
      %c0_14 = arith.constant 0 : index
      %20 = vector.load %arg6[%c0_13, %c0_14] : memref<256x128xf32, #tpu.memory_space<vmem>>, vector<256x128xf32>
      tpu.vector_store %arg6[%c0_13, %c0_14], %19 {strides = array<i32>} : memref<256x128xf32, #tpu.memory_space<vmem>>, vector<256x128xf32>,
    } else {
    }
    return
  }
  func.func @transform_0(%arg0: i32, %arg1: i32) -> (i32, i32) {
    %c0_i32 = arith.constant 0 : i32
    return %arg0, %arg1 : i32, i32
  }
  func.func @transform_1(%arg0: i32, %arg1: i32) -> (i32, i32) {
    %c0_i32 = arith.constant 0 : i32
    %c0_i32_0 = arith.constant 0 : i32
    %c0_i32_1 = arith.constant 0 : i32
    return %c0_i32, %c0_i32_0 : i32, i32
  }
  func.func @transform_2(%arg0: i32, %arg1: i32) -> (i32, i32) {
    %c0_i32 = arith.constant 0 : i32
    %c0_i32_0 = arith.constant 0 : i32
    return %arg0, %c0_i32 : i32, i32
  }
  func.func @transform_3(%arg0: i32, %arg1: i32) -> (i32, i32) {
    %c0_i32 = arith.constant 0 : i32
    %c0_i32_0 = arith.constant 0 : i32
    %c0_i32_1 = arith.constant 0 : i32
    return %c0_i32, %c0_i32_0 : i32, i32
  }
  func.func @transform_4(%arg0: i32, %arg1: i32) -> (i32, i32) {
    %c0_i32 = arith.constant 0 : i32
    %c0_i32_0 = arith.constant 0 : i32
    return %arg0, %c0_i32 : i32, i32
  }
}

</mosaic_0001>

<bundles_post_ra>
// kernel: tpu_custom_call.1
= control target key start
LH: loop header
LB: loop body
LE: loop exit
PB: predicated region body
PF: predicated region fallthrough
CT: control target
= control target key end

     0   :  { %s2136_s0 = inlined_call_operand.hbm [shape: f32[512,512], index: 0, kind: input, shape index: {}]   ;;  %s2137_s1 = inlined_call_operand.hbm [shape: bf16[512,128], index: 1, kind: input, shape index: {}]   ;;  %s2138_s2 = inlined_call_operand.hbm [shape: bf16[512,128], index: 2, kind: input, shape index: {}]   ;;  %s2139_s3 = inlined_call_operand.hbm [shape: bf16[128,128], index: 3, kind: input, shape index: {}]   ;;  %s2140_s4 = inlined_call_operand.hbm [shape: f32[512,128], index: 4, kind: output, shape index: {}]  }
   0x1   :  { %2152 = sst [smem:[#allocation23_spill]] %s2136_s0 }
   0x2   :  { %2153 = sst [smem:[#allocation24_spill]] %s2137_s1 }
   0x3   :  { %2154 = sst [smem:[#allocation25_spill]] %s2140_s4 }
   0x4   :  { %9 = vsyncpa [#allocation4], 0 }
   0x5   :  { %11 = vsyncpa [#allocation4 + $0x1], 0 }
   0x6   :  { %12 = vsyncpa [#allocation7], 0 }
   0x7   :  { %13 = vsyncpa [#allocation5], 0 }
   0x8   :  { %15 = vsyncpa [#allocation5 + $0x1], 0  ;;  %s1786_s15 = smov 0   ;;  %s1788_s16 = smov 0  }
   0x9   :  { %s1790_s17 = smov 0   ;;  %s1792_s18 = smov 0  }
   0xa   :  { %s1794_s19 = smov 0   ;;  %s1796_s20 = smov 0  }
   0xb   :  { %s1798_s21 = smov 0   ;;  %s1800_s22 = smov 0  }
   0xc   :  { %s1802_s23 = smov 0   ;;  %s1804_s24 = smov 0  }
   0xd   :  { %s1806_s25 = smov 0  }
   0xe LB: > { %2155 = sst [smem:[#allocation16_spill]] %s1710_s15  ;;  %s1840_s26 = sadd.s32 4294967295, %s1750_s25   ;;  %s1750_s25 = sphi %s1806_s25, %s21_s25   ;;  %s1746_s24 = sphi %s1804_s24, %s2191_s24   ;;  %s1742_s23 = sphi %s1802_s23, %s2190_s23   ;;  %s1738_s22 = sphi %s1800_s22, %s2180_s22   ;;  %s1734_s21 = sphi %s1798_s21, %s2189_s21   ;;  %s1730_s20 = sphi %s1796_s20, %s2188_s20   ;;  %s1726_s19 = sphi %s1794_s19, %s2187_s19   ;;  %s1722_s18 = sphi %s1792_s18, %s2186_s18   ;;  %s1718_s17 = sphi %s1790_s17, %s2185_s17   ;;  %s1714_s16 = sphi %s1788_s16, %s2184_s16   ;;  %s1710_s15 = sphi %s1786_s15, %s2183_s15  }
   0xf   : > { %2156 = sst [smem:[#allocation17_spill]] %s1734_s21  ;;  %s1124_s27 = sadd.s32 4294967294, %s1750_s25  }
  0x10   : > { %2157 = sst [smem:[#allocation18_spill]] %s1738_s22  ;;  %p55_p0 = scmp.ne.s32.totalorder %s1726_s19, %s1722_s18 }
  0x11   : > { %2158 = sst [smem:[#allocation19_spill]] %s1746_s24  ;;  %p56_p1 = scmp.eq.s32.totalorder %s1840_s26, 0 }
  0x12   : > { %p102_p2 = scmp.ne.s32.totalorder %s1714_s16, %s1710_s15  ;;  %p147_p3 = scmp.eq.s32.totalorder %s1840_s26, 7 }
  0x13   : > { %p1850_p4 = por %p56_p1, %p55_p0  ;;  %p153_p5 = scmp.eq.s32.totalorder %s1124_s27, 7 }
  0x14   : > { %p1856_p6 = por %p102_p2, %p56_p1  ;;  %p1125_p7 = scmp.ge.s32.totalorder %s1750_s25, 1 }
  0x15   : > { %p1861_p8 = por %p153_p5, %p102_p2  ;;  %p160_p9 = scmp.lt.s32.totalorder %s1750_s25, 9 }
  0x16   : > { %s2163_s1 = sld [smem:[#allocation24_spill]]  ;;  %s1752_s9 = smov [#allocation6]  }
  0x17   : > { %s2161_s30 = scalar_select %p1861_p8, 1, 0 }
  0x18   : > { %p1869_p10 = pnand %p1125_p7, %p160_p9  ;;  %s173_s10 = sshll.u32 %s1752_s9, 4  ;;  %s174_s10 = int_to_ptr.vmem [resolvable:$true] %s173_s10 }
  0x19   : > { %2162 = sst [smem:[#allocation20_spill]] %s2161_s30  ;;  %s2141_s12 = smov 64  }
  0x1a   : > { %p1375_p11 = pneg %p1869_p10  ;;  %s2143_s13 = smov 4  }
  0x1b   : > { %s30_s14 = sadd.s32 1, %s1742_s23  ;;  %s33_s18 = sadd.s32 1, %s1746_s24 }
  0x1c   : > { %s171_s7 = sshll.u32 %s2163_s1, 4  ;;  %p1877_p12 = pnand %p1375_p11, %p56_p1  ;;  %s172_s7 = int_to_ptr.hbm [resolvable:$true] %s171_s7 }
  0x1d   : > { %p31_p13 = scmp.ge.s32.totalorder %s30_s14, 4  ;;  %s42_s27 = sadd.s32 1, %s1730_s20 }
  0x1e   : > { %1378 = dma.hbm_to_vmem [thread:$0]  (!%p1877_p12), %s172_s7, 4096, %s174_s10, [#allocation7], %s2141_s12, %s2141_s12, %s2143_s13  }
  0x1f   : > { %p49_p0 = scmp.ne.s32.totalorder %s1730_s20, %s1726_s19  ;;  %s2193_s14 = smov (%p31_p13, %s30_s14), 0 }
  0x20   : > { %2166 = sst [smem:[#allocation21_spill]] %s2193_s14  ;;  %s2195_s18 = smov (!%p31_p13, %s33_s18), %s1746_s24 }
  0x21   : > { %s38_s5 = ssub.s32 %s1742_s23, %s2193_s14  ;;  %p50_p2 = scmp.eq.s32.totalorder %s1750_s25, 0 }
  0x22   : > { %p35_p5 = scmp.ge.s32.totalorder %s2195_s18, 2  ;;  %p1395_p7 = scmp.lt.s32.totalorder %s1750_s25, 8 }
  0x23   : > { %p1900_p9 = por %p50_p2, %p49_p0  ;;  %s201_s7 = sand.u32 1, %s1750_s25  }
  0x24   : > { %s2197_s18 = smov (%p35_p5, %s2195_s18), 0  ;;  %s203_s9 = sand.u32 1, %s1730_s20  }
  0x25   : > { %2168 = sst [smem:[#allocation22_spill]] %s2197_s18  ;;  %s1910_s10 = ssub.s32 %s1746_s24, %s2197_s18 }
  0x26   : > { %s1129_s12 = sshll.u32 %s203_s9, 8  ;;  %s39_s13 = sor.u32 %s38_s5, %s1910_s10 }
  0x27   : > { %p87_p11 = scmp.eq.s32.totalorder %s1910_s10, 0  ;;  %p40_p13 = scmp.eq.s32.totalorder %s39_s13, 0 }
  0x28   : > { %s1215_s1 = sshll.u32 %s1746_s24, 7  ;;  %s205_s14 = scalar_lea.vmem [#allocation3], %s1129_s12 }
  0x29   : > { %s215_s30 = sshll.u32 %s205_s14, 4  ;;  %s210_s4 = sadd.s32 %s1742_s23, %s1215_s1  ;;  %s216_s30 = int_to_ptr.vmem [resolvable:$true] %s215_s30 }
  0x2a   : > { %s1916_s15 = scalar_select %p40_p13, %s1730_s20, %s42_s27  }
  0x2b   : > { %s1132_s22 = sshll.u32 %s210_s4, 3  ;;  %p1383_p0 = pnand %p1395_p7, %p1900_p9 }
  0x2c   : > { %s2169_s0 = sld [smem:[#allocation23_spill]]  ;;  %s185_s4 = sshll.u32 %s2139_s3, 4  ;;  %s186_s4 = int_to_ptr.hbm [resolvable:$true] %s185_s4 }
  0x2d   : > { %s202_s27 = scalar_lea.sflag [#allocation4], %s201_s7  ;;  %s1755_s6 = smov 512  }
  0x2e   : > { %s1756_s9 = smov 128   ;;  %s1757_s24 = smov 8  }
  0x2f   : > { %s1758_s21 = smov [#allocation9]   ;;  %s2170_s18 = smov 4  }
  0x30   : > { %p96_p5 = scmp.ne.s32.totalorder %s1718_s17, %s1714_s16  ;;  %s234_s11 = scalar_lea.hbm %s2138_s2, %s1215_s1 }
  0x31   : > { %s253_s1 = sand.u32 (!%p1869_p10), 1, %s1726_s19  }
  0x32   : > { %s212_s5 = scalar_lea.hbm %s2169_s0, %s1132_s22  ;;  %s187_s22 = sshll.u32 %s1758_s21, 4  ;;  %s188_s22 = int_to_ptr.vmem [resolvable:$true] %s187_s22 }
  0x33   : > { %s213_s12 = sshll.u32 %s212_s5, 4  ;;  %s2171_s5 = smov 64   ;;  %s214_s12 = int_to_ptr.hbm [resolvable:$true] %s213_s12 }
  0x34   : > { %1385 = dma.hbm_to_vmem [thread:$0]  (!%p1383_p0), %s214_s12, 4096, %s216_s30, %s202_s27, %s1755_s6, %s1756_s9, %s1757_s24  }
  0x35   : > { %1381 = dma.hbm_to_vmem [thread:$0]  (!%p1877_p12), %s186_s4, 1024, %s188_s22, [#allocation7], %s2171_s5, %s2171_s5, %s2170_s18  }
  0x36   : > { %s89_s0 = sadd.s32 1, %s1718_s17  ;;  %p98_p9 = por %p96_p5, %p50_p2 }
  0x37   : > { %s1940_s13 = scalar_select %p87_p11, %s1718_s17, %s89_s0  }
  0x38   : > { %p1946_p13 = por %p147_p3, %p96_p5  ;;  %s227_s30 = sand.u32 1, %s1718_s17  }
  0x39   : > { %s1133_s14 = sshll.u32 %s227_s30, 7  ;;  %s235_s6 = sshll.u32 %s234_s11, 4  ;;  %s236_s6 = int_to_ptr.hbm [resolvable:$true] %s235_s6 }
  0x3a   : > { %s229_s4 = scalar_lea.vmem [#allocation8], %s1133_s14  ;;  %p1386_p12 = pnand %p1395_p7, %p98_p9 }
  0x3b   : > { %s237_s9 = sshll.u32 %s229_s4, 4  ;;  %249 = sbr.rel (%p1869_p10) target bundleno = 603 (0x25b), region = 36  ;;  %s238_s9 = int_to_ptr.vmem [resolvable:$true] %s237_s9 }
  0x3c   : > { %1388 = dma.hbm_to_vmem [thread:$0]  (!%p1386_p12), %s236_s6, 2048, %s238_s9, %s202_s27, %s2171_s5, %s2171_s5, %s2170_s18  }
  0x3d   : > { %s251_s0 = sand.u32 (!%p1869_p10), 1, %s1840_s26   ;;  %s1137_s10 = sshll.u32 (!%p1869_p10), %s253_s1, 8 }
  0x3e   : > { %s252_s21 = scalar_lea.sflag (!%p1869_p10), [#allocation4], %s251_s0  ;;  %s1963_s22 = scalar_lea.vmem (!%p1869_p10), [#allocation3], %s1137_s10 }
  0x40   : > { %1689 = dma.done.wait (%p1850_p4), %s252_s21, 4096  }
  0x41   : > { %1691 = vsyncadd (%p1850_p4), %s252_s21, 4294963200 }
  0x42   : > { %1693 = dma.done.wait (%p56_p1), [#allocation7], 4096  }
  0x43   : > { %1695 = vsyncadd (%p56_p1), [#allocation7], 4294963200  ;;  %s1974_s8 = sand.u32 1, %s1714_s16  }
  0x44   : > { %s1139_s27 = sshll.u32 %s1974_s8, 7 }
  0x45   : > { %s1977_s18 = scalar_lea.vmem [#allocation8], %s1139_s27 }
  0x46   : > { %1697 = dma.done.wait (%p1856_p6), %s252_s21, 2048  }
  0x47   : > { %1699 = vsyncadd (%p1856_p6), %s252_s21, 4294965248 }
  0x48   : > { %1701 = dma.done.wait (%p56_p1), [#allocation7], 1024  }
  0x49   : > { %1703 = vsyncadd (%p56_p1), [#allocation7], 4294966272  ;;  %s1141_s28 = sshll.u32 %s1974_s8, 8  ;;  %s2173_s30 = sld [smem:[#allocation17_spill]] }
  0x4a   : > { %s1988_s5 = scalar_lea.vmem [#allocation10], %s1141_s28 }
  0x4f   : > { %p1142_p3 = scmp.ne.s32.totalorder %s2173_s30, 0 }
  0x51   : > { %312 = sbr.rel (%p1142_p3) target bundleno = 123 (0x7b), region = 56 }
  0x56   : > { %v1235_v0 = vld [vmem:[%s1977_s18] sm:$0xff]   ;;  %v1298_v1 = vld [vmem:[%s1977_s18 + $0x8] sm:$0xff]   ;;  %v1299_v2 = vld [vmem:[%s1977_s18 + $0x10] sm:$0xff]  }
  0x57   : > { %v1236_v3 = vunpack.c.l.bf16 %v1235_v0  ;;  %v1237_v4 = vunpack.c.h.bf16 %v1235_v0  ;;  %v1240_v5 = vunpack.c.l.bf16 %v1298_v1  ;;  %v1241_v6 = vunpack.c.h.bf16 %v1298_v1  ;;  %v1300_v7 = vld [vmem:[%s1977_s18 + $0x18] sm:$0xff]   ;;  %v1301_v10 = vld [vmem:[%s1977_s18 + $0x20] sm:$0xff]   ;;  %v1302_v17 = vld [vmem:[%s1977_s18 + $0x28] sm:$0xff]  }
  0x58   : > { %v1244_v8 = vunpack.c.l.bf16 %v1299_v2  ;;  %v1245_v9 = vunpack.c.h.bf16 %v1299_v2  ;;  %v1248_v14 = vunpack.c.l.bf16 %v1300_v7  ;;  %v1249_v16 = vunpack.c.h.bf16 %v1300_v7  ;;  %v1303_v22 = vld [vmem:[%s1977_s18 + $0x30] sm:$0xff]   ;;  %v1304_v27 = vld [vmem:[%s1977_s18 + $0x38] sm:$0xff]   ;;  %v1305_v32 = vld [vmem:[%s1977_s18 + $0x40] sm:$0xff]  }
  0x59   : > { %v377_v11 = vmul.f32 0.1, %v1236_v3  ;;  %v378_v12 = vmul.f32 0.1, %v1237_v4  ;;  %v379_v13 = vmul.f32 0.1, %v1240_v5  ;;  %v1252_v19 = vunpack.c.l.bf16 %v1301_v10 }
  0x5a   : > { %v380_v15 = vmul.f32 0.1, %v1241_v6  ;;  %v381_v18 = vmul.f32 0.1, %v1244_v8  ;;  %v382_v20 = vmul.f32 0.1, %v1245_v9  ;;  %v1253_v21 = vunpack.c.h.bf16 %v1301_v10 }
  0x5b   : > { %409 = vst [vmem:[#allocation2 + $0xb0] sm:$0xff] %v377_v11  ;;  %v383_v23 = vmul.f32 0.1, %v1248_v14  ;;  %v1256_v24 = vunpack.c.l.bf16 %v1302_v17  ;;  %v384_v25 = vmul.f32 0.1, %v1249_v16  ;;  %v1257_v26 = vunpack.c.h.bf16 %v1302_v17  ;;  %v1306_v37 = vld [vmem:[%s1977_s18 + $0x48] sm:$0xff]  }
  0x5c   : > { %410 = vst [vmem:[#allocation2] sm:$0xff] %v378_v12  ;;  %v385_v28 = vmul.f32 0.1, %v1252_v19  ;;  %v1260_v29 = vunpack.c.l.bf16 %v1303_v22  ;;  %v386_v30 = vmul.f32 0.1, %v1253_v21  ;;  %v1261_v31 = vunpack.c.h.bf16 %v1303_v22  ;;  %v1307_v42 = vld [vmem:[%s1977_s18 + $0x50] sm:$0xff]  }
  0x5d   : > { %411 = vst [vmem:[#allocation2 + $0xd8] sm:$0xff] %v379_v13  ;;  %v387_v33 = vmul.f32 0.1, %v1256_v24  ;;  %v1264_v34 = vunpack.c.l.bf16 %v1304_v27  ;;  %v388_v35 = vmul.f32 0.1, %v1257_v26  ;;  %v1265_v36 = vunpack.c.h.bf16 %v1304_v27  ;;  %v1308_v47 = vld [vmem:[%s1977_s18 + $0x58] sm:$0xff]  }
  0x5e   : > { %412 = vst [vmem:[#allocation2 + $0x18] sm:$0xff] %v380_v15  ;;  %v389_v38 = vmul.f32 0.1, %v1260_v29  ;;  %v1268_v39 = vunpack.c.l.bf16 %v1305_v32  ;;  %v390_v40 = vmul.f32 0.1, %v1261_v31  ;;  %v1269_v41 = vunpack.c.h.bf16 %v1305_v32  ;;  %v1309_v52 = vld [vmem:[%s1977_s18 + $0x60] sm:$0xff]  }
  0x5f   : > { %413 = vst [vmem:[#allocation2 + $0x50] sm:$0xff] %v381_v18  ;;  %v391_v43 = vmul.f32 0.1, %v1264_v34  ;;  %v1272_v44 = vunpack.c.l.bf16 %v1306_v37  ;;  %v392_v45 = vmul.f32 0.1, %v1265_v36  ;;  %v1273_v46 = vunpack.c.h.bf16 %v1306_v37  ;;  %v1310_v57 = vld [vmem:[%s1977_s18 + $0x68] sm:$0xff]  }
  0x60   : > { %414 = vst [vmem:[#allocation2 + $0x68] sm:$0xff] %v382_v20  ;;  %v393_v48 = vmul.f32 0.1, %v1268_v39  ;;  %v1276_v49 = vunpack.c.l.bf16 %v1307_v42  ;;  %v394_v50 = vmul.f32 0.1, %v1269_v41  ;;  %v1277_v51 = vunpack.c.h.bf16 %v1307_v42  ;;  %v1311_v62 = vld [vmem:[%s1977_s18 + $0x70] sm:$0xff]  }
  0x61   : > { %415 = vst [vmem:[#allocation2 + $0x30] sm:$0xff] %v383_v23  ;;  %v395_v53 = vmul.f32 0.1, %v1272_v44  ;;  %v1280_v54 = vunpack.c.l.bf16 %v1308_v47  ;;  %v396_v55 = vmul.f32 0.1, %v1273_v46  ;;  %v1281_v56 = vunpack.c.h.bf16 %v1308_v47  ;;  %v1312_v3 = vld [vmem:[%s1977_s18 + $0x78] sm:$0xff]  }
  0x62   : > { %416 = vst [vmem:[#allocation2 + $0x48] sm:$0xff] %v384_v25  ;;  %v397_v58 = vmul.f32 0.1, %v1276_v49  ;;  %v1284_v59 = vunpack.c.l.bf16 %v1309_v52  ;;  %v398_v60 = vmul.f32 0.1, %v1277_v51  ;;  %v1285_v61 = vunpack.c.h.bf16 %v1309_v52 }
  0x63   : > { %417 = vst [vmem:[#allocation2 + $0x80] sm:$0xff] %v385_v28  ;;  %v399_v63 = vmul.f32 0.1, %v1280_v54  ;;  %v1288_v0 = vunpack.c.l.bf16 %v1310_v57  ;;  %v400_v1 = vmul.f32 0.1, %v1281_v56  ;;  %v1289_v2 = vunpack.c.h.bf16 %v1310_v57 }
  0x64   : > { %418 = vst [vmem:[#allocation2 + $0x88] sm:$0xff] %v386_v30  ;;  %v401_v4 = vmul.f32 0.1, %v1284_v59  ;;  %v1292_v5 = vunpack.c.l.bf16 %v1311_v62  ;;  %v402_v6 = vmul.f32 0.1, %v1285_v61  ;;  %v1293_v7 = vunpack.c.h.bf16 %v1311_v62 }
  0x65   : > { %419 = vst [vmem:[#allocation2 + $0xe8] sm:$0xff] %v387_v33  ;;  %v403_v8 = vmul.f32 0.1, %v1288_v0  ;;  %v1296_v9 = vunpack.c.l.bf16 %v1312_v3  ;;  %v404_v10 = vmul.f32 0.1, %v1289_v2  ;;  %v1297_v11 = vunpack.c.h.bf16 %v1312_v3 }
  0x66   : > { %420 = vst [vmem:[#allocation2 + $0xb8] sm:$0xff] %v388_v35  ;;  %v405_v12 = vmul.f32 0.1, %v1292_v5  ;;  %v406_v13 = vmul.f32 0.1, %v1293_v7 }
  0x67   : > { %421 = vst [vmem:[#allocation2 + $0x60] sm:$0xff] %v389_v38  ;;  %v407_v14 = vmul.f32 0.1, %v1296_v9  ;;  %v408_v15 = vmul.f32 0.1, %v1297_v11 }
  0x68   : > { %422 = vst [vmem:[#allocation2 + $0xf0] sm:$0xff] %v390_v40 }
  0x69   : > { %423 = vst [vmem:[#allocation2 + $0x8] sm:$0xff] %v391_v43 }
  0x6a   : > { %424 = vst [vmem:[#allocation2 + $0x78] sm:$0xff] %v392_v45 }
  0x6b   : > { %425 = vst [vmem:[#allocation2 + $0x38] sm:$0xff] %v393_v48 }
  0x6c   : > { %426 = vst [vmem:[#allocation2 + $0x58] sm:$0xff] %v394_v50 }
  0x6d   : > { %427 = vst [vmem:[#allocation2 + $0x40] sm:$0xff] %v395_v53 }
  0x6e   : > { %428 = vst [vmem:[#allocation2 + $0xc8] sm:$0xff] %v396_v55 }
  0x6f   : > { %429 = vst [vmem:[#allocation2 + $0xe0] sm:$0xff] %v397_v58 }
  0x70   : > { %430 = vst [vmem:[#allocation2 + $0x90] sm:$0xff] %v398_v60 }
  0x71   : > { %431 = vst [vmem:[#allocation2 + $0x70] sm:$0xff] %v399_v63 }
  0x72   : > { %432 = vst [vmem:[#allocation2 + $0xc0] sm:$0xff] %v400_v1 }
  0x73   : > { %433 = vst [vmem:[#allocation2 + $0xa8] sm:$0xff] %v401_v4 }
  0x74   : > { %434 = vst [vmem:[#allocation2 + $0xd0] sm:$0xff] %v402_v6 }
  0x75   : > { %435 = vst [vmem:[#allocation2 + $0x10] sm:$0xff] %v403_v8 }
  0x76   : > { %436 = vst [vmem:[#allocation2 + $0x28] sm:$0xff] %v404_v10 }
  0x77   : > { %437 = vst [vmem:[#allocation2 + $0xa0] sm:$0xff] %v405_v12 }
  0x78   : > { %438 = vst [vmem:[#allocation2 + $0xf8] sm:$0xff] %v406_v13 }
  0x79   : > { %439 = vst [vmem:[#allocation2 + $0x20] sm:$0xff] %v407_v14 }
  0x7a   : > { %440 = vst [vmem:[#allocation2 + $0x98] sm:$0xff] %v408_v15 }
  0x7b PF: > { %s2174_s26 = sld [smem:[#allocation17_spill]]  ;;  %v462_v23 = vld [vmem:[%s1963_s22] sm:$0xff]  ;;  %v463_v24 = vld [vmem:[%s1963_s22 + $0x8] sm:$0xff]  ;;  %v464_v36 = vld [vmem:[%s1963_s22 + $0x10] sm:$0xff] }
  0x7c   : > { %v470_v25 = vld [vmem:[%s1963_s22 + $0x40] sm:$0xff]  ;;  %v471_v27 = vld [vmem:[%s1963_s22 + $0x48] sm:$0xff]  ;;  %v494_v32 = vpack.c.bf16 %v463_v24, %v462_v23  ;;  %v465_v37 = vld [vmem:[%s1963_s22 + $0x18] sm:$0xff] }
  0x7d   : > { %v478_v28 = vld [vmem:[%s1963_s22 + $0x80] sm:$0xff]  ;;  %v479_v29 = vld [vmem:[%s1963_s22 + $0x88] sm:$0xff]  ;;  %v498_v33 = vpack.c.bf16 %v471_v27, %v470_v25  ;;  %v472_v38 = vld [vmem:[%s1963_s22 + $0x50] sm:$0xff]  ;;  %v495_v44 = vpack.c.bf16 %v465_v37, %v464_v36 }
  0x7e   : > { %v486_v30 = vld [vmem:[%s1963_s22 + $0xc0] sm:$0xff]  ;;  %v487_v31 = vld [vmem:[%s1963_s22 + $0xc8] sm:$0xff]  ;;  %v502_v34 = vpack.c.bf16 %v479_v29, %v478_v28  ;;  %v473_v39 = vld [vmem:[%s1963_s22 + $0x58] sm:$0xff] }
  0x7f   : > { %v506_v35 = vpack.c.bf16 %v487_v31, %v486_v30  ;;  %v480_v40 = vld [vmem:[%s1963_s22 + $0x90] sm:$0xff]  ;;  %v481_v41 = vld [vmem:[%s1963_s22 + $0x98] sm:$0xff]  ;;  %v499_v45 = vpack.c.bf16 %v473_v39, %v472_v38  ;;  %v466_v48 = vld [vmem:[%s1963_s22 + $0x20] sm:$0xff] }
  0x80   : > { %v488_v42 = vld [vmem:[%s1963_s22 + $0xd0] sm:$0xff]  ;;  %v489_v43 = vld [vmem:[%s1963_s22 + $0xd8] sm:$0xff]  ;;  %v503_v46 = vpack.c.bf16 %v481_v41, %v480_v40  ;;  %v467_v49 = vld [vmem:[%s1963_s22 + $0x28] sm:$0xff] }
  0x81   : > { %s1143_s29 = sshll.u32 %s2174_s26, 7  ;;  %v507_v47 = vpack.c.bf16 %v489_v43, %v488_v42  ;;  %v474_v50 = vld [vmem:[%s1963_s22 + $0x60] sm:$0xff]  ;;  %v475_v51 = vld [vmem:[%s1963_s22 + $0x68] sm:$0xff]  ;;  %v496_v56 = vpack.c.bf16 %v467_v49, %v466_v48  ;;  %v468_v60 = vld [vmem:[%s1963_s22 + $0x30] sm:$0xff]  ;;  %p1177_p1 = scmp.ne.s32.totalorder %s2174_s26, 3 }
  0x82   : > { %s442_s7 = sshra.s32 %s1143_s29, 3  ;;  %v482_v52 = vld [vmem:[%s1963_s22 + $0xa0] sm:$0xff]  ;;  %v483_v53 = vld [vmem:[%s1963_s22 + $0xa8] sm:$0xff]  ;;  %v500_v57 = vpack.c.bf16 %v475_v51, %v474_v50  ;;  %v469_v61 = vld [vmem:[%s1963_s22 + $0x38] sm:$0xff] }
  0x83   : > { %s1144_s12 = sshll.u32 %s442_s7, 2  ;;  %v490_v54 = vld [vmem:[%s1963_s22 + $0xe0] sm:$0xff]  ;;  %v491_v55 = vld [vmem:[%s1963_s22 + $0xe8] sm:$0xff]  ;;  %v504_v58 = vpack.c.bf16 %v483_v53, %v482_v52  ;;  %v476_v62 = vld [vmem:[%s1963_s22 + $0x70] sm:$0xff]  ;;  %v497_v4 = vpack.c.bf16 %v469_v61, %v468_v60 }
  0x84   : > { %s2008_s11 = scalar_lea.vmem [#allocation6], %s1144_s12  ;;  %v508_v59 = vpack.c.bf16 %v491_v55, %v490_v54  ;;  %v477_v63 = vld [vmem:[%s1963_s22 + $0x78] sm:$0xff]  ;;  %v484_v0 = vld [vmem:[%s1963_s22 + $0xb0] sm:$0xff]  ;;  %v518_v9 = vld [vmem:[#allocation2 + $0x80] sm:$0xff] }
  0x85   : > { %v1224_v16 = vld [vmem:[%s2008_s11 + $0x38] sm:$0xff]  ;;  %v1223_v17 = vld [vmem:[%s2008_s11 + $0x30] sm:$0xff]  ;;  %v1222_v18 = vld [vmem:[%s2008_s11 + $0x28] sm:$0xff]  ;;  %v501_v5 = vpack.c.bf16 %v477_v63, %v476_v62 }
  0x86   : > { %590 = vmatpush.bf16.msra.mxu0 %v1224_v16  ;;  %1313 = vmatpush.bf16.msra.mxu1 %v1224_v16  ;;  %v1221_v19 = vld [vmem:[%s2008_s11 + $0x20] sm:$0xff]  ;;  %v1220_v20 = vld [vmem:[%s2008_s11 + $0x18] sm:$0xff]  ;;  %v1219_v21 = vld [vmem:[%s2008_s11 + $0x10] sm:$0xff] }
  0x87   : > { %1314 = vmatpush.bf16.msra.mxu2 %v1224_v16  ;;  %1315 = vmatpush.bf16.msra.mxu3 %v1224_v16  ;;  %v1218_v22 = vld [vmem:[%s2008_s11 + $0x8] sm:$0xff]  ;;  %v1217_v26 = vld [vmem:[%s2008_s11] sm:$0xff]  ;;  %v485_v1 = vld [vmem:[%s1963_s22 + $0xb8] sm:$0xff] }
  0x88   : > { %v492_v2 = vld [vmem:[%s1963_s22 + $0xf0] sm:$0xff]  ;;  %v493_v3 = vld [vmem:[%s1963_s22 + $0xf8] sm:$0xff]  ;;  %v505_v6 = vpack.c.bf16 %v485_v1, %v484_v0  ;;  %v534_v15 = vld [vmem:[#allocation2 + $0xa8] sm:$0xff] }
  0x89   : > { %v509_v7 = vpack.c.bf16 %v493_v3, %v492_v2  ;;  %v510_v8 = vld [vmem:[#allocation2 + $0xb0] sm:$0xff]  ;;  %v526_v14 = vld [vmem:[#allocation2 + $0x38] sm:$0xff]  ;;  %v511_v16 = vld [vmem:[#allocation2] sm:$0xff] }
  0x8a   : > { %591 = vmatpush.bf16.msra.mxu0 %v1223_v17  ;;  %1316 = vmatpush.bf16.msra.mxu1 %v1223_v17  ;;  %v535_v27 = vld [vmem:[#allocation2 + $0xd0] sm:$0xff]  ;;  %v512_v28 = vld [vmem:[#allocation2 + $0xd8] sm:$0xff]  ;;  %v520_v29 = vld [vmem:[#allocation2 + $0xe8] sm:$0xff] }
  0x8b   : > { %1317 = vmatpush.bf16.msra.mxu2 %v1223_v17  ;;  %1318 = vmatpush.bf16.msra.mxu3 %v1223_v17  ;;  %v519_v17 = vld [vmem:[#allocation2 + $0x88] sm:$0xff]  ;;  %v528_v38 = vld [vmem:[#allocation2 + $0x40] sm:$0xff]  ;;  %v536_v39 = vld [vmem:[#allocation2 + $0x10] sm:$0xff] }
  0x8c   : > { %v513_v40 = vld [vmem:[#allocation2 + $0x18] sm:$0xff]  ;;  %v529_v50 = vld [vmem:[#allocation2 + $0xc8] sm:$0xff]  ;;  %v514_v52 = vld [vmem:[#allocation2 + $0x50] sm:$0xff] }
  0x8d   : > { %v521_v41 = vld [vmem:[#allocation2 + $0xb8] sm:$0xff]  ;;  %v537_v51 = vld [vmem:[#allocation2 + $0x28] sm:$0xff]  ;;  %v522_v53 = vld [vmem:[#allocation2 + $0x60] sm:$0xff] }
  0x8e   : > { %592 = vmatpush.bf16.msra.mxu0 %v1222_v18  ;;  %1319 = vmatpush.bf16.msra.mxu1 %v1222_v18  ;;  %v530_v62 = vld [vmem:[#allocation2 + $0xe0] sm:$0xff]  ;;  %v515_v0 = vld [vmem:[#allocation2 + $0x68] sm:$0xff]  ;;  %v523_v1 = vld [vmem:[#allocation2 + $0xf0] sm:$0xff] }
  0x8f   : > { %1320 = vmatpush.bf16.msra.mxu2 %v1222_v18  ;;  %1321 = vmatpush.bf16.msra.mxu3 %v1222_v18  ;;  %v538_v63 = vld [vmem:[#allocation2 + $0xa0] sm:$0xff] }
  0x92   : > { %593 = vmatpush.bf16.msra.mxu0 %v1221_v19  ;;  %1322 = vmatpush.bf16.msra.mxu1 %v1221_v19 }
  0x93   : > { %1323 = vmatpush.bf16.msra.mxu2 %v1221_v19  ;;  %1324 = vmatpush.bf16.msra.mxu3 %v1221_v19 }
  0x96   : > { %594 = vmatpush.bf16.msra.mxu0 %v1220_v20  ;;  %1325 = vmatpush.bf16.msra.mxu1 %v1220_v20 }
  0x97   : > { %1326 = vmatpush.bf16.msra.mxu2 %v1220_v20  ;;  %1327 = vmatpush.bf16.msra.mxu3 %v1220_v20 }
  0x9a   : > { %595 = vmatpush.bf16.msra.mxu0 %v1219_v21  ;;  %1328 = vmatpush.bf16.msra.mxu1 %v1219_v21 }
  0x9b   : > { %1329 = vmatpush.bf16.msra.mxu2 %v1219_v21  ;;  %1330 = vmatpush.bf16.msra.mxu3 %v1219_v21 }
  0x9e   : > { %596 = vmatpush.bf16.msra.mxu0 %v1218_v22  ;;  %1331 = vmatpush.bf16.msra.mxu1 %v1218_v22 }
  0x9f   : > { %1332 = vmatpush.bf16.msra.mxu2 %v1218_v22  ;;  %1333 = vmatpush.bf16.msra.mxu3 %v1218_v22 }
  0xa2   : > { %597 = vmatpush.bf16.msra.mxu0 %v1217_v26  ;;  %1334 = vmatpush.bf16.msra.mxu1 %v1217_v26 }
  0xa3   : > { %1335 = vmatpush.bf16.msra.mxu2 %v1217_v26  ;;  %1336 = vmatpush.bf16.msra.mxu3 %v1217_v26  ;;  %v527_v26 = vld [vmem:[#allocation2 + $0x58] sm:$0xff] }
  0xa5   : > { %598 = vmatmul.bf16.vlgmr.msra.gmra.mxu0 %v494_v32  ;;  %618 = vmatmul.bf16.vlgmr.msra.gmra.mxu1 %v498_v33 }
  0xa6   : > { %638 = vmatmul.bf16.vlgmr.msra.gmra.mxu2 %v502_v34  ;;  %658 = vmatmul.bf16.vlgmr.msra.gmra.mxu3 %v506_v35 }
  0xb5   : > { %603 = vmatmul.bf16.gmra.mxu0 %v495_v44  ;;  %623 = vmatmul.bf16.gmra.mxu1 %v499_v45 }
  0xb6   : > { %643 = vmatmul.bf16.gmra.mxu2 %v503_v46  ;;  %663 = vmatmul.bf16.gmra.mxu3 %v507_v47 }
  0xc5   : > { %608 = vmatmul.bf16.gmra.mxu0 %v496_v56  ;;  %628 = vmatmul.bf16.gmra.mxu1 %v500_v57 }
  0xc6   : > { %648 = vmatmul.bf16.gmra.mxu2 %v504_v58  ;;  %668 = vmatmul.bf16.gmra.mxu3 %v508_v59 }
  0xd5   : > { %613 = vmatmul.bf16.gmra.mxu0 %v497_v4  ;;  %633 = vmatmul.bf16.gmra.mxu1 %v501_v5 }
  0xd6   : > { %653 = vmatmul.bf16.gmra.mxu2 %v505_v6  ;;  %673 = vmatmul.bf16.gmra.mxu3 %v509_v7 }
 0x122   : > { %v599_v10 = vpop.f32.mrf.mxu0  ;;  %v619_v11 = vpop.f32.mrf.mxu1 }
 0x123   : > { %v679_v12 = vadd.f32 %v599_v10, %v510_v8  ;;  %v687_v13 = vadd.f32 %v619_v11, %v518_v9  ;;  %v531_v10 = vld [vmem:[#allocation2 + $0x90] sm:$0xff]  ;;  %v539_v11 = vld [vmem:[#allocation2 + $0xf8] sm:$0xff] }
 0x125   : > { %711 = vst [vmem:[#allocation2 + $0xb0] sm:$0xff] %v679_v12  ;;  %v516_v12 = vld [vmem:[#allocation2 + $0x30] sm:$0xff] }
 0x126   : > { %719 = vst [vmem:[#allocation2 + $0x80] sm:$0xff] %v687_v13  ;;  %v524_v13 = vld [vmem:[#allocation2 + $0x8] sm:$0xff] }
 0x129   : > { %v639_v18 = vpop.f32.mrf.mxu2  ;;  %v659_v19 = vpop.f32.mrf.mxu3 }
 0x12a   : > { %v695_v20 = vadd.f32 %v639_v18, %v526_v14  ;;  %v703_v21 = vadd.f32 %v659_v19, %v534_v15  ;;  %v601_v22 = vpop.f32.mrf.mxu0  ;;  %v621_v23 = vpop.f32.mrf.mxu1 }
 0x12b   : > { %v680_v24 = vadd.f32 %v601_v22, %v511_v16  ;;  %v688_v25 = vadd.f32 %v621_v23, %v519_v17  ;;  %v532_v22 = vld [vmem:[#allocation2 + $0x70] sm:$0xff]  ;;  %v540_v23 = vld [vmem:[#allocation2 + $0x20] sm:$0xff] }
 0x12c   : > { %727 = vst [vmem:[#allocation2 + $0x38] sm:$0xff] %v695_v20 }
 0x12d   : > { %735 = vst [vmem:[#allocation2 + $0xa8] sm:$0xff] %v703_v21 }
 0x12e   : > { %712 = vst [vmem:[#allocation2] sm:$0xff] %v680_v24  ;;  %v517_v24 = vld [vmem:[#allocation2 + $0x48] sm:$0xff] }
 0x12f   : > { %720 = vst [vmem:[#allocation2 + $0x88] sm:$0xff] %v688_v25  ;;  %v525_v25 = vld [vmem:[#allocation2 + $0x78] sm:$0xff] }
 0x131   : > { %v641_v30 = vpop.f32.mrf.mxu2  ;;  %v661_v31 = vpop.f32.mrf.mxu3 }
 0x132   : > { %v696_v32 = vadd.f32 %v641_v30, %v527_v26  ;;  %v704_v33 = vadd.f32 %v661_v31, %v535_v27  ;;  %v604_v34 = vpop.f32.mrf.mxu0  ;;  %v624_v35 = vpop.f32.mrf.mxu1 }
 0x133   : > { %v681_v36 = vadd.f32 %v604_v34, %v512_v28  ;;  %v689_v37 = vadd.f32 %v624_v35, %v520_v29  ;;  %v533_v34 = vld [vmem:[#allocation2 + $0xc0] sm:$0xff]  ;;  %v541_v35 = vld [vmem:[#allocation2 + $0x98] sm:$0xff] }
 0x134   : > { %728 = vst [vmem:[#allocation2 + $0x58] sm:$0xff] %v696_v32 }
 0x135   : > { %736 = vst [vmem:[#allocation2 + $0xd0] sm:$0xff] %v704_v33 }
 0x136   : > { %713 = vst [vmem:[#allocation2 + $0xd8] sm:$0xff] %v681_v36 }
 0x137   : > { %721 = vst [vmem:[#allocation2 + $0xe8] sm:$0xff] %v689_v37 }
 0x139   : > { %v644_v42 = vpop.f32.mrf.mxu2  ;;  %v664_v43 = vpop.f32.mrf.mxu3 }
 0x13a   : > { %v697_v44 = vadd.f32 %v644_v42, %v528_v38  ;;  %v705_v45 = vadd.f32 %v664_v43, %v536_v39  ;;  %v606_v46 = vpop.f32.mrf.mxu0  ;;  %v626_v47 = vpop.f32.mrf.mxu1 }
 0x13b   : > { %v682_v48 = vadd.f32 %v606_v46, %v513_v40  ;;  %v690_v49 = vadd.f32 %v626_v47, %v521_v41 }
 0x13c   : > { %729 = vst [vmem:[#allocation2 + $0x40] sm:$0xff] %v697_v44 }
 0x13d   : > { %737 = vst [vmem:[#allocation2 + $0x10] sm:$0xff] %v705_v45 }
 0x13e   : > { %714 = vst [vmem:[#allocation2 + $0x18] sm:$0xff] %v682_v48 }
 0x13f   : > { %722 = vst [vmem:[#allocation2 + $0xb8] sm:$0xff] %v690_v49 }
 0x141   : > { %v646_v54 = vpop.f32.mrf.mxu2  ;;  %v666_v55 = vpop.f32.mrf.mxu3 }
 0x142   : > { %v698_v56 = vadd.f32 %v646_v54, %v529_v50  ;;  %v706_v57 = vadd.f32 %v666_v55, %v537_v51  ;;  %v609_v58 = vpop.f32.mrf.mxu0  ;;  %v629_v59 = vpop.f32.mrf.mxu1 }
 0x143   : > { %v683_v60 = vadd.f32 %v609_v58, %v514_v52  ;;  %v691_v61 = vadd.f32 %v629_v59, %v522_v53 }
 0x144   : > { %730 = vst [vmem:[#allocation2 + $0xc8] sm:$0xff] %v698_v56 }
 0x145   : > { %738 = vst [vmem:[#allocation2 + $0x28] sm:$0xff] %v706_v57 }
 0x146   : > { %715 = vst [vmem:[#allocation2 + $0x50] sm:$0xff] %v683_v60 }
 0x147   : > { %723 = vst [vmem:[#allocation2 + $0x60] sm:$0xff] %v691_v61 }
 0x149   : > { %v649_v2 = vpop.f32.mrf.mxu2  ;;  %v669_v3 = vpop.f32.mrf.mxu3 }
 0x14a   : > { %v699_v4 = vadd.f32 %v649_v2, %v530_v62  ;;  %v707_v5 = vadd.f32 %v669_v3, %v538_v63  ;;  %v611_v6 = vpop.f32.mrf.mxu0  ;;  %v631_v7 = vpop.f32.mrf.mxu1 }
 0x14b   : > { %v684_v8 = vadd.f32 %v611_v6, %v515_v0  ;;  %v692_v9 = vadd.f32 %v631_v7, %v523_v1 }
 0x14c   : > { %731 = vst [vmem:[#allocation2 + $0xe0] sm:$0xff] %v699_v4 }
 0x14d   : > { %739 = vst [vmem:[#allocation2 + $0xa0] sm:$0xff] %v707_v5 }
 0x14e   : > { %716 = vst [vmem:[#allocation2 + $0x68] sm:$0xff] %v684_v8 }
 0x14f   : > { %724 = vst [vmem:[#allocation2 + $0xf0] sm:$0xff] %v692_v9 }
 0x151   : > { %v651_v14 = vpop.f32.mrf.mxu2  ;;  %v671_v15 = vpop.f32.mrf.mxu3 }
 0x152   : > { %v700_v16 = vadd.f32 %v651_v14, %v531_v10  ;;  %v708_v17 = vadd.f32 %v671_v15, %v539_v11  ;;  %v614_v18 = vpop.f32.mrf.mxu0  ;;  %v634_v19 = vpop.f32.mrf.mxu1 }
 0x153   : > { %v685_v20 = vadd.f32 %v614_v18, %v516_v12  ;;  %v693_v21 = vadd.f32 %v634_v19, %v524_v13 }
 0x154   : > { %732 = vst [vmem:[#allocation2 + $0x90] sm:$0xff] %v700_v16 }
 0x155   : > { %740 = vst [vmem:[#allocation2 + $0xf8] sm:$0xff] %v708_v17 }
 0x156   : > { %717 = vst [vmem:[#allocation2 + $0x30] sm:$0xff] %v685_v20 }
 0x157   : > { %725 = vst [vmem:[#allocation2 + $0x8] sm:$0xff] %v693_v21 }
 0x159   : > { %v654_v26 = vpop.f32.mrf.mxu2  ;;  %v674_v27 = vpop.f32.mrf.mxu3 }
 0x15a   : > { %v701_v28 = vadd.f32 %v654_v26, %v532_v22  ;;  %v709_v29 = vadd.f32 %v674_v27, %v540_v23  ;;  %v616_v30 = vpop.f32.mrf.mxu0  ;;  %v636_v31 = vpop.f32.mrf.mxu1 }
 0x15b   : > { %v686_v32 = vadd.f32 %v616_v30, %v517_v24  ;;  %v694_v33 = vadd.f32 %v636_v31, %v525_v25 }
 0x15c   : > { %733 = vst [vmem:[#allocation2 + $0x70] sm:$0xff] %v701_v28 }
 0x15d   : > { %741 = vst [vmem:[#allocation2 + $0x20] sm:$0xff] %v709_v29 }
 0x15e   : > { %718 = vst [vmem:[#allocation2 + $0x48] sm:$0xff] %v686_v32 }
 0x15f   : > { %726 = vst [vmem:[#allocation2 + $0x78] sm:$0xff] %v694_v33 }
 0x161   : > { %v656_v36 = vpop.f32.mrf.mxu2  ;;  %v676_v37 = vpop.f32.mrf.mxu3  ;;  %746 = sbr.rel (%p1177_p1) target bundleno = 581 (0x245), region = 60 }
 0x162   : > { %v702_v38 = vadd.f32 %v656_v36, %v533_v34  ;;  %v710_v39 = vadd.f32 %v676_v37, %v541_v35 }
 0x164   : > { %734 = vst [vmem:[#allocation2 + $0xc0] sm:$0xff] %v702_v38 }
 0x165   : > { %742 = vst [vmem:[#allocation2 + $0x98] sm:$0xff] %v710_v39 }
 0x166   : > { %v1232_v40 = vld [vmem:[#allocation9 + $0x38] sm:$0xff]  ;;  %v1231_v41 = vld [vmem:[#allocation9 + $0x30] sm:$0xff]  ;;  %v1230_v42 = vld [vmem:[#allocation9 + $0x28] sm:$0xff] }
 0x167   : > { %859 = vmatpush.bf16.msra.mxu0 %v1232_v40  ;;  %1337 = vmatpush.bf16.msra.mxu1 %v1232_v40  ;;  %v1229_v43 = vld [vmem:[#allocation9 + $0x20] sm:$0xff]  ;;  %v1228_v44 = vld [vmem:[#allocation9 + $0x18] sm:$0xff]  ;;  %v1227_v45 = vld [vmem:[#allocation9 + $0x10] sm:$0xff] }
 0x168   : > { %1338 = vmatpush.bf16.msra.mxu2 %v1232_v40  ;;  %1339 = vmatpush.bf16.msra.mxu3 %v1232_v40  ;;  %v1226_v46 = vld [vmem:[#allocation9 + $0x8] sm:$0xff]  ;;  %v1225_v47 = vld [vmem:[#allocation9] sm:$0xff]  ;;  %v747_v48 = vld [vmem:[#allocation2 + $0xb0] sm:$0xff] }
 0x169   : > { %v748_v49 = vld [vmem:[#allocation2] sm:$0xff]  ;;  %v756_v51 = vld [vmem:[#allocation2 + $0x88] sm:$0xff]  ;;  %v763_v52 = vld [vmem:[#allocation2 + $0x38] sm:$0xff] }
 0x16a   : > { %v755_v50 = vld [vmem:[#allocation2 + $0x80] sm:$0xff]  ;;  %v764_v53 = vld [vmem:[#allocation2 + $0x58] sm:$0xff]  ;;  %v771_v54 = vld [vmem:[#allocation2 + $0xa8] sm:$0xff]  ;;  %v779_v56 = vpack.c.bf16 %v748_v49, %v747_v48 }
 0x16b   : > { %860 = vmatpush.bf16.msra.mxu0 %v1231_v41  ;;  %1340 = vmatpush.bf16.msra.mxu1 %v1231_v41  ;;  %v772_v55 = vld [vmem:[#allocation2 + $0xd0] sm:$0xff]  ;;  %v783_v57 = vpack.c.bf16 %v756_v51, %v755_v50  ;;  %v787_v58 = vpack.c.bf16 %v764_v53, %v763_v52  ;;  %v749_v60 = vld [vmem:[#allocation2 + $0xd8] sm:$0xff]  ;;  %v757_v62 = vld [vmem:[#allocation2 + $0xe8] sm:$0xff] }
 0x16c   : > { %1341 = vmatpush.bf16.msra.mxu2 %v1231_v41  ;;  %1342 = vmatpush.bf16.msra.mxu3 %v1231_v41  ;;  %v791_v59 = vpack.c.bf16 %v772_v55, %v771_v54  ;;  %v750_v61 = vld [vmem:[#allocation2 + $0x18] sm:$0xff]  ;;  %v765_v0 = vld [vmem:[#allocation2 + $0x40] sm:$0xff]  ;;  %v766_v1 = vld [vmem:[#allocation2 + $0xc8] sm:$0xff] }
 0x16d   : > { %v758_v63 = vld [vmem:[#allocation2 + $0xb8] sm:$0xff]  ;;  %v773_v2 = vld [vmem:[#allocation2 + $0x10] sm:$0xff]  ;;  %v774_v3 = vld [vmem:[#allocation2 + $0x28] sm:$0xff]  ;;  %v780_v4 = vpack.c.bf16 %v750_v61, %v749_v60  ;;  %v788_v6 = vpack.c.bf16 %v766_v1, %v765_v0 }
 0x16e   : > { %v784_v5 = vpack.c.bf16 %v758_v63, %v757_v62  ;;  %v792_v7 = vpack.c.bf16 %v774_v3, %v773_v2  ;;  %v751_v8 = vld [vmem:[#allocation2 + $0x50] sm:$0xff]  ;;  %v752_v9 = vld [vmem:[#allocation2 + $0x68] sm:$0xff]  ;;  %v759_v10 = vld [vmem:[#allocation2 + $0x60] sm:$0xff] }
 0x16f   : > { %861 = vmatpush.bf16.msra.mxu0 %v1230_v42  ;;  %1343 = vmatpush.bf16.msra.mxu1 %v1230_v42  ;;  %v760_v11 = vld [vmem:[#allocation2 + $0xf0] sm:$0xff]  ;;  %v767_v12 = vld [vmem:[#allocation2 + $0xe0] sm:$0xff]  ;;  %v776_v15 = vld [vmem:[#allocation2 + $0xf8] sm:$0xff]  ;;  %v781_v16 = vpack.c.bf16 %v752_v9, %v751_v8 }
 0x170   : > { %1344 = vmatpush.bf16.msra.mxu2 %v1230_v42  ;;  %1345 = vmatpush.bf16.msra.mxu3 %v1230_v42  ;;  %v768_v13 = vld [vmem:[#allocation2 + $0x90] sm:$0xff]  ;;  %v775_v14 = vld [vmem:[#allocation2 + $0xa0] sm:$0xff]  ;;  %v785_v17 = vpack.c.bf16 %v760_v11, %v759_v10  ;;  %v754_v21 = vld [vmem:[#allocation2 + $0x48] sm:$0xff] }
 0x171   : > { %v789_v18 = vpack.c.bf16 %v768_v13, %v767_v12  ;;  %v793_v19 = vpack.c.bf16 %v776_v15, %v775_v14  ;;  %v753_v20 = vld [vmem:[#allocation2 + $0x30] sm:$0xff]  ;;  %v761_v22 = vld [vmem:[#allocation2 + $0x8] sm:$0xff]  ;;  %v762_v23 = vld [vmem:[#allocation2 + $0x78] sm:$0xff] }
 0x172   : > { %v769_v24 = vld [vmem:[#allocation2 + $0x70] sm:$0xff]  ;;  %v770_v25 = vld [vmem:[#allocation2 + $0xc0] sm:$0xff]  ;;  %v778_v27 = vld [vmem:[#allocation2 + $0x98] sm:$0xff]  ;;  %v782_v28 = vpack.c.bf16 %v754_v21, %v753_v20  ;;  %v786_v29 = vpack.c.bf16 %v762_v23, %v761_v22 }
 0x173   : > { %862 = vmatpush.bf16.msra.mxu0 %v1229_v43  ;;  %1346 = vmatpush.bf16.msra.mxu1 %v1229_v43  ;;  %v777_v26 = vld [vmem:[#allocation2 + $0x20] sm:$0xff]  ;;  %v790_v30 = vpack.c.bf16 %v770_v25, %v769_v24 }
 0x174   : > { %1347 = vmatpush.bf16.msra.mxu2 %v1229_v43  ;;  %1348 = vmatpush.bf16.msra.mxu3 %v1229_v43  ;;  %v794_v31 = vpack.c.bf16 %v778_v27, %v777_v26 }
 0x177   : > { %863 = vmatpush.bf16.msra.mxu0 %v1228_v44  ;;  %1349 = vmatpush.bf16.msra.mxu1 %v1228_v44 }
 0x178   : > { %1350 = vmatpush.bf16.msra.mxu2 %v1228_v44  ;;  %1351 = vmatpush.bf16.msra.mxu3 %v1228_v44 }
 0x17b   : > { %864 = vmatpush.bf16.msra.mxu0 %v1227_v45  ;;  %1352 = vmatpush.bf16.msra.mxu1 %v1227_v45 }
 0x17c   : > { %1353 = vmatpush.bf16.msra.mxu2 %v1227_v45  ;;  %1354 = vmatpush.bf16.msra.mxu3 %v1227_v45 }
 0x17f   : > { %865 = vmatpush.bf16.msra.mxu0 %v1226_v46  ;;  %1355 = vmatpush.bf16.msra.mxu1 %v1226_v46 }
 0x180   : > { %1356 = vmatpush.bf16.msra.mxu2 %v1226_v46  ;;  %1357 = vmatpush.bf16.msra.mxu3 %v1226_v46 }
 0x183   : > { %866 = vmatpush.bf16.msra.mxu0 %v1225_v47  ;;  %1358 = vmatpush.bf16.msra.mxu1 %v1225_v47 }
 0x184   : > { %1359 = vmatpush.bf16.msra.mxu2 %v1225_v47  ;;  %1360 = vmatpush.bf16.msra.mxu3 %v1225_v47 }
 0x186   : > { %867 = vmatmul.bf16.vlgmr.msra.gmra.mxu0 %v779_v56  ;;  %887 = vmatmul.bf16.vlgmr.msra.gmra.mxu1 %v783_v57 }
 0x187   : > { %907 = vmatmul.bf16.vlgmr.msra.gmra.mxu2 %v787_v58  ;;  %927 = vmatmul.bf16.vlgmr.msra.gmra.mxu3 %v791_v59 }
 0x196   : > { %872 = vmatmul.bf16.gmra.mxu0 %v780_v4  ;;  %892 = vmatmul.bf16.gmra.mxu1 %v784_v5 }
 0x197   : > { %912 = vmatmul.bf16.gmra.mxu2 %v788_v6  ;;  %932 = vmatmul.bf16.gmra.mxu3 %v792_v7 }
 0x1a6   : > { %877 = vmatmul.bf16.gmra.mxu0 %v781_v16  ;;  %897 = vmatmul.bf16.gmra.mxu1 %v785_v17 }
 0x1a7   : > { %917 = vmatmul.bf16.gmra.mxu2 %v789_v18  ;;  %937 = vmatmul.bf16.gmra.mxu3 %v793_v19 }
 0x1b6   : > { %882 = vmatmul.bf16.gmra.mxu0 %v782_v28  ;;  %902 = vmatmul.bf16.gmra.mxu1 %v786_v29 }
 0x1b7   : > { %922 = vmatmul.bf16.gmra.mxu2 %v790_v30  ;;  %942 = vmatmul.bf16.gmra.mxu3 %v794_v31 }
 0x203   : > { %v868_v32 = vpop.f32.mrf.mxu0  ;;  %v888_v33 = vpop.f32.mrf.mxu1 }
 0x204   : > { %948 = vst [vmem:[%s1988_s5] sm:$0xff] %v868_v32 }
 0x205   : > { %956 = vst [vmem:[%s1988_s5 + $0x40] sm:$0xff] %v888_v33 }
 0x20a   : > { %v908_v34 = vpop.f32.mrf.mxu2  ;;  %v928_v35 = vpop.f32.mrf.mxu3 }
 0x20b   : > { %964 = vst [vmem:[%s1988_s5 + $0x80] sm:$0xff] %v908_v34  ;;  %v870_v36 = vpop.f32.mrf.mxu0  ;;  %v890_v37 = vpop.f32.mrf.mxu1 }
 0x20c   : > { %972 = vst [vmem:[%s1988_s5 + $0xc0] sm:$0xff] %v928_v35 }
 0x20d   : > { %949 = vst [vmem:[%s1988_s5 + $0x8] sm:$0xff] %v870_v36 }
 0x20e   : > { %957 = vst [vmem:[%s1988_s5 + $0x48] sm:$0xff] %v890_v37 }
 0x212   : > { %v910_v38 = vpop.f32.mrf.mxu2  ;;  %v930_v39 = vpop.f32.mrf.mxu3 }
 0x213   : > { %965 = vst [vmem:[%s1988_s5 + $0x88] sm:$0xff] %v910_v38  ;;  %v873_v40 = vpop.f32.mrf.mxu0  ;;  %v893_v41 = vpop.f32.mrf.mxu1 }
 0x214   : > { %973 = vst [vmem:[%s1988_s5 + $0xc8] sm:$0xff] %v930_v39 }
 0x215   : > { %950 = vst [vmem:[%s1988_s5 + $0x10] sm:$0xff] %v873_v40 }
 0x216   : > { %958 = vst [vmem:[%s1988_s5 + $0x50] sm:$0xff] %v893_v41 }
 0x21a   : > { %v913_v42 = vpop.f32.mrf.mxu2  ;;  %v933_v43 = vpop.f32.mrf.mxu3 }
 0x21b   : > { %966 = vst [vmem:[%s1988_s5 + $0x90] sm:$0xff] %v913_v42  ;;  %v875_v44 = vpop.f32.mrf.mxu0  ;;  %v895_v45 = vpop.f32.mrf.mxu1 }
 0x21c   : > { %974 = vst [vmem:[%s1988_s5 + $0xd0] sm:$0xff] %v933_v43 }
 0x21d   : > { %951 = vst [vmem:[%s1988_s5 + $0x18] sm:$0xff] %v875_v44 }
 0x21e   : > { %959 = vst [vmem:[%s1988_s5 + $0x58] sm:$0xff] %v895_v45 }
 0x222   : > { %v915_v46 = vpop.f32.mrf.mxu2  ;;  %v935_v47 = vpop.f32.mrf.mxu3 }
 0x223   : > { %967 = vst [vmem:[%s1988_s5 + $0x98] sm:$0xff] %v915_v46  ;;  %v878_v48 = vpop.f32.mrf.mxu0  ;;  %v898_v49 = vpop.f32.mrf.mxu1 }
 0x224   : > { %975 = vst [vmem:[%s1988_s5 + $0xd8] sm:$0xff] %v935_v47 }
 0x225   : > { %952 = vst [vmem:[%s1988_s5 + $0x20] sm:$0xff] %v878_v48 }
 0x226   : > { %960 = vst [vmem:[%s1988_s5 + $0x60] sm:$0xff] %v898_v49 }
 0x22a   : > { %v918_v50 = vpop.f32.mrf.mxu2  ;;  %v938_v51 = vpop.f32.mrf.mxu3 }
 0x22b   : > { %968 = vst [vmem:[%s1988_s5 + $0xa0] sm:$0xff] %v918_v50  ;;  %v880_v52 = vpop.f32.mrf.mxu0  ;;  %v900_v53 = vpop.f32.mrf.mxu1 }
 0x22c   : > { %976 = vst [vmem:[%s1988_s5 + $0xe0] sm:$0xff] %v938_v51 }
 0x22d   : > { %953 = vst [vmem:[%s1988_s5 + $0x28] sm:$0xff] %v880_v52 }
 0x22e   : > { %961 = vst [vmem:[%s1988_s5 + $0x68] sm:$0xff] %v900_v53 }
 0x232   : > { %v920_v54 = vpop.f32.mrf.mxu2  ;;  %v940_v55 = vpop.f32.mrf.mxu3 }
 0x233   : > { %969 = vst [vmem:[%s1988_s5 + $0xa8] sm:$0xff] %v920_v54  ;;  %v883_v56 = vpop.f32.mrf.mxu0  ;;  %v903_v57 = vpop.f32.mrf.mxu1 }
 0x234   : > { %977 = vst [vmem:[%s1988_s5 + $0xe8] sm:$0xff] %v940_v55 }
 0x235   : > { %954 = vst [vmem:[%s1988_s5 + $0x30] sm:$0xff] %v883_v56 }
 0x236   : > { %962 = vst [vmem:[%s1988_s5 + $0x70] sm:$0xff] %v903_v57 }
 0x23a   : > { %v923_v58 = vpop.f32.mrf.mxu2  ;;  %v943_v59 = vpop.f32.mrf.mxu3 }
 0x23b   : > { %970 = vst [vmem:[%s1988_s5 + $0xb0] sm:$0xff] %v923_v58  ;;  %v885_v60 = vpop.f32.mrf.mxu0  ;;  %v905_v61 = vpop.f32.mrf.mxu1 }
 0x23c   : > { %978 = vst [vmem:[%s1988_s5 + $0xf0] sm:$0xff] %v943_v59 }
 0x23d   : > { %955 = vst [vmem:[%s1988_s5 + $0x38] sm:$0xff] %v885_v60 }
 0x23e   : > { %963 = vst [vmem:[%s1988_s5 + $0x78] sm:$0xff] %v905_v61 }
 0x242   : > { %v925_v62 = vpop.f32.mrf.mxu2  ;;  %v945_v63 = vpop.f32.mrf.mxu3 }
 0x243   : > { %971 = vst [vmem:[%s1988_s5 + $0xb8] sm:$0xff] %v925_v62 }
 0x244   : > { %979 = vst [vmem:[%s1988_s5 + $0xf8] sm:$0xff] %v945_v63 }
 0x245 PF: > { %s2175_s14 = sld [smem:[#allocation18_spill]]  ;;  %s993_s10 = sshll.u32 %s1988_s5, 4  ;;  %s994_s10 = int_to_ptr.vmem [resolvable:$true] %s993_s10 }
 0x246   : > { %s2176_s0 = sld [smem:[#allocation25_spill]]  ;;  %s981_s22 = scalar_lea.sflag [#allocation5], %s1974_s8 }
 0x24b   : > { %s1233_s6 = sshll.u32 %s2175_s14, 8 }
 0x24c   : > { %s992_s1 = scalar_lea.hbm %s2176_s0, %s1233_s6  ;;  %s1636_s26 = scalar_lea.hbm %s2176_s0, 512 }
 0x24d   : > { %s995_s21 = sshll.u32 %s992_s1, 4  ;;  %s996_s21 = int_to_ptr.hbm [resolvable:$true] %s995_s21 }
 0x24e   : > { %s1630_s27 = sshra.s32 %s996_s21, 4  ;;  %s1631_s27 = int_to_ptr.hbm [resolvable:$true] %s1630_s27 }
 0x24f   : > { %s1632_s18 = scalar_lea.hbm %s1631_s27, 256  ;;  %p1637_p2 = scmp.lt.s32.totalorder %s1631_s27, %s2176_s0 }
 0x250   : > { %p1633_p4 = scmp.ne.s32.totalorder %s1631_s27, %s1632_s18  ;;  %p1638_p7 = scmp.lt.s32.totalorder %s1636_s26, %s1632_s18 }
 0x252   : > { %p1634_p6 = pnand %p1633_p4, %p1946_p13  ;;  %p1639_p11 = por %p1638_p7, %p1637_p2 }
 0x254   : > { %p1635_p10 = pneg %p1634_p6 }
 0x256   : > { %p1640_p0 = pnand %p1639_p11, %p1635_p10 }
 0x258   : > { %1643 = shalt.err (!%p1640_p0)
}
 0x259   : > { %s1759_s8 = smov 128   ;;  %s1760_s5 = smov 8  }
 0x25a   : > { %1373 = dma.vmem_to_hbm [thread:$0]  (%p1946_p13), %s994_s10, 4096, %s996_s21, %s981_s22, %s1759_s8, %s1759_s8, %s1760_s5  }
 0x25b PF: > { %s2177_s12 = sld [smem:[#allocation16_spill]]  ;;  %p1398_p5 = scmp.ge.s32.totalorder %s1750_s25, 2 }
 0x25d   : > { %p1390_p9 = pnand %p1398_p5, %p1861_p8 }
 0x25f   : > { %p1391_p12 = pneg %p1390_p9 }
 0x261   : > { %s1010_s14 = sand.u32 1, %s2177_s12  }
 0x262   : > { %s1011_s6 = scalar_lea.sflag [#allocation5], %s1010_s14 }
 0x263   : > { %1705 = dma.done.wait (%p1391_p12), %s1011_s6, 4096  }
 0x264   : > { %1707 = vsyncadd (%p1391_p12), %s1011_s6, 4294963200  ;;  %s21_s25 = sadd.s32 1, %s1750_s25   ;;  %s2179_s24 = smov %s1916_s15 }
 0x265   : > { %p18_p3 = scmp.ge.s32.totalorder %s21_s25, 10   ;;  %s2180_s22 = sld [smem:[#allocation19_spill]] }
 0x266   : > { %s2181_s4 = sld [smem:[#allocation21_spill]]  ;;  %s2183_s15 = smov %s1714_s16 }
 0x267   : > { %s2182_s9 = sld [smem:[#allocation22_spill]]  ;;  %s2184_s16 = smov %s1718_s17 }
 0x268   : > { %s2185_s17 = smov %s1940_s13  ;;  %s2186_s18 = smov %s1726_s19 }
 0x269   : > { %s2187_s19 = smov %s1730_s20  ;;  %s2188_s20 = smov %s2179_s24 }
 0x26a   : > { %s2189_s21 = smov %s1742_s23  ;;  %20 = sbr.rel (!%p18_p3) target bundleno = 14 (0xe), region = 109 }
 0x26c   : > { %s2190_s23 = smov %s2181_s4 }
 0x26d   : > { %s2191_s24 = smov %s2182_s9 }
 0x26f   :  { %1017 = vsyncpa [#allocation4], 1 }
 0x270   :  { %1019 = vsyncpa [#allocation4 + $0x1], 1 }
 0x271   :  { %1020 = vsyncpa [#allocation7], 1 }
 0x272   :  { %1021 = vsyncpa [#allocation5], 1 }
 0x273   :  { %1023 = vsyncpa [#allocation5 + $0x1], 1 }

</bundles_post_ra>
